<compile_context>
chip_gen: v6e
topology: v6e:2x2x1
jax: 0.10.0
libtpu: 0.0.40
codegen_flags: <defaults>
</compile_context>

<pallas_src>
from functools import partial

import jax
import jax.numpy as jnp
from jax.experimental import pallas as pl
from jax.experimental.pallas import tpu as pltpu

# cfg.gamma_range is an external config constant in the original repo
# (IA-YOLO default is 3.0); fixed deterministically here.
GAMMA_RANGE = 3.0


def _gamma_kernel(gamma_ref, img_ref, out_ref, *, compute_dtype):
    # gamma_ref: (B,) float32 in SMEM (scalar prefetch; gamma precomputed)
    # img_ref / out_ref: (1, TR, lanes) block in VMEM, in the caller's dtype
    b = pl.program_id(0)
    gamma = gamma_ref[b].astype(compute_dtype)

    x = img_ref[...].astype(compute_dtype)
    # scalar operand (not full_like) so the select broadcasts in-register
    x = jnp.where(x <= 0, jnp.asarray(1e-5, dtype=compute_dtype), x)
    # x > 0 after the clamp, so pow(x, gamma) == exp(gamma * log(x)); both
    # transcendentals land on the (otherwise idle) EUP slot.
    out_ref[...] = jnp.exp(gamma * jnp.log(x)).astype(out_ref.dtype)


def _chip_generation():
    """Best-effort TPU generation detection (5 / 6 / 7, or 0 if unknown)."""
    try:
        kind = jax.devices()[0].device_kind.lower()
    except Exception:  # pragma: no cover - defensive
        return 0
    if "v7" in kind:
        return 7
    if "v6" in kind:
        return 6
    if "v5" in kind:
        return 5
    return 0


def _pick_tile_rows(R, B, max_rows, min_total_steps=8):
    """Pick a row-tile: multiple of 8, <= max_rows, enough grid steps, and
    (when cheaply possible) dividing R exactly so every block is uniform."""
    max_rows = max(8, (max_rows // 8) * 8)
    want_blocks = max(
        1,
        -(-min_total_steps // max(B, 1)),  # enough steps for pipelining / megacore
        -(-R // max_rows),                 # each block fits the VMEM budget
    )
    want_blocks = min(want_blocks, max(1, R // 8))  # keep tr >= 8
    tr = -(-R // want_blocks)
    tr = ((tr + 7) // 8) * 8
    if tr >= R:
        return R
    # Prefer a tr that divides R exactly (no ragged masked tail), but don't
    # shrink blocks by more than 2x to find one.
    if R % 8 == 0 and R % tr != 0:
        t = tr
        while t >= 8 and t > tr // 2:
            if R % t == 0:
                return t
            t -= 8
    return tr


def gamma_filter(img, param, gamma_range=GAMMA_RANGE, donate_img=False):
    """img: (B, C, H, W); param: (B, 1, 1, 1) per-batch scalar.

    Output has the same shape and dtype as `img`.
    """
    B, C, H, W = img.shape
    dtype = img.dtype
    itemsize = jnp.dtype(dtype).itemsize
    N = C * H * W

    # Precompute the per-batch exponent once (tiny (B,) op) and prefetch it.
    p = param.reshape(B).astype(jnp.float32)
    gamma = jnp.exp((jnp.tanh(p) * 0.5 + 0.5) * (2.0 * gamma_range) - gamma_range)

    # ---- lane-dense (B, R, lanes) view, avoiding padded HBM copies ----------
    lanes = 128
    padded = False
    if N % 128 != 0:
        lanes = 1
        while lanes < 128 and N % (lanes * 2) == 0:
            lanes *= 2
        if lanes < 8:
            # TODO(synk): pathological N with no 8-aligned power-of-two divisor;
            # fall back to one padded copy (extra HBM pass) rather than a
            # 1..4-lane layout.
            lanes = 128
            padded = True

    if padded:
        n_pad = pl.cdiv(N, 128) * 128
        flat = jnp.pad(img.reshape(B, N), ((0, 0), (0, n_pad - N)),
                       constant_values=1.0)  # log(1)=0 -> benign, sliced off
        R = n_pad // 128
        x3 = flat.reshape(B, R, 128)
    else:
        R = N // lanes
        x3 = img.reshape(B, R, lanes)

    # ---- generation-aware tile size and VMEM budget --------------------------
    gen = _chip_generation()
    if gen >= 7:
        max_block_bytes = 4 << 20        # 64 MiB physical VMEM on v7x
        vmem_limit = 48 << 20
    elif gen == 6:
        max_block_bytes = 8 << 20        # 128 MiB physical VMEM on v6e
        vmem_limit = 64 << 20
    else:                                # v5e / unknown: 16 MiB default scoped VMEM
        max_block_bytes = 2 << 20
        vmem_limit = None
    max_rows = max(8, max_block_bytes // (lanes * itemsize))
    tr = _pick_tile_rows(R, B, max_rows)
    grid = (B, pl.cdiv(R, tr))

    # bf16 I/O on v6e/v7x keeps the whole pipeline bf16 (bf16 EUP/VPU);
    # everything else computes in f32 (v5e has no bf16 VPU/EUP).
    if dtype == jnp.bfloat16 and gen >= 6:
        compute_dtype = jnp.bfloat16
    else:
        compute_dtype = jnp.float32

    cp_kwargs = dict(dimension_semantics=("parallel", "parallel"))
    if vmem_limit is not None:
        cp_kwargs["vmem_limit_bytes"] = vmem_limit

    call_kwargs = {}
    if donate_img:
        # img is arg index 1 (gamma is the scalar-prefetch arg 0).
        call_kwargs["input_output_aliases"] = {1: 0}

    out3 = pl.pallas_call(
        partial(_gamma_kernel, compute_dtype=compute_dtype),
        out_shape=jax.ShapeDtypeStruct((B, R, lanes), dtype),
        grid_spec=pltpu.PrefetchScalarGridSpec(
            num_scalar_prefetch=1,
            grid=grid,
            in_specs=[
                pl.BlockSpec((1, tr, lanes), lambda b, r, g_ref: (b, r, 0)),
            ],
            out_specs=pl.BlockSpec((1, tr, lanes), lambda b, r, g_ref: (b, r, 0)),
        ),
        compiler_params=pltpu.CompilerParams(**cp_kwargs),
        cost_estimate=pl.CostEstimate(
            flops=3 * B * N,
            transcendentals=2 * B * N,
            bytes_accessed=2 * B * N * itemsize,
        ),
        **call_kwargs,
    )(gamma, x3)

    if padded:
        out = out3.reshape(B, -1)[:, :N].reshape(B, C, H, W)
    else:
        out = out3.reshape(B, C, H, W)
    return out


def gamma_filter_ref(img, param, gamma_range=GAMMA_RANGE):
    """Pure-JAX reference mirroring the PyTorch forward."""
    gamma = jnp.exp((jnp.tanh(param) * 0.5 + 0.5) * (2.0 * gamma_range) - gamma_range)
    zero = jnp.zeros_like(img) + 1e-5
    x = jnp.where(img <= 0, zero, img)
    return jnp.power(x, gamma)


if __name__ == "__main__":
    B, C, H, W = 2, 4, 16, 16
    key = jax.random.PRNGKey(0)
    k_img, k_param = jax.random.split(key)

    # Image values in roughly [-0.2, 1.0] so the (img <= 0 -> 1e-5) branch is exercised.
    img = jax.random.uniform(k_img, (B, C, H, W), dtype=jnp.float32,
                             minval=-0.2, maxval=1.0)
    # Per-batch filter parameter, shaped (B, 1, 1, 1) as produced by the filter regressor.
    param = jax.random.normal(k_param, (B, 1, 1, 1), dtype=jnp.float32)

    out = jax.block_until_ready(gamma_filter(img, param))
    ref = jax.block_until_ready(gamma_filter_ref(img, param))

    assert out.shape == (B, C, H, W)
    assert out.dtype == img.dtype
    assert jnp.allclose(out, ref, rtol=1e-5, atol=1e-5), "mismatch vs reference"
    print("KERNEL_OK")
</pallas_src>

<mosaic_0001>
module attributes {stable_mosaic.version = 11 : i64} {
  func.func @_gamma_kernel(%arg0: i32, %arg1: i32, %arg2: memref<2xf32, #tpu.memory_space<smem>>, %arg3: memref<1x8x128xf32, #tpu.memory_space<vmem>>, %arg4: memref<1x8x128xf32, #tpu.memory_space<vmem>>) attributes {dimension_semantics = [#tpu.dimension_semantics<parallel>, #tpu.dimension_semantics<parallel>], iteration_bounds = array<i64: 2, 1>, scalar_prefetch = 1 : i64, scratch_operands = 0 : i64, tpu.core_type = #tpu.core_type<tc>, window_params = [{transform_indices = @transform_0, window_bounds = array<i64: 1, 8, 128>}, {transform_indices = @transform_1, window_bounds = array<i64: 1, 8, 128>}]} {
    %0 = arith.index_cast %arg0 : i32 to index
    %1 = memref.load %arg2[%0] : memref<2xf32, #tpu.memory_space<smem>>
    %c0 = arith.constant 0 : index
    %c0_0 = arith.constant 0 : index
    %c0_1 = arith.constant 0 : index
    %2 = vector.load %arg3[%c0, %c0_0, %c0_1] : memref<1x8x128xf32, #tpu.memory_space<vmem>>, vector<1x8x128xf32>
    %cst = arith.constant 0.000000e+00 : f32
    %3 = vector.broadcast %cst : f32 to vector<1x8x128xf32>
    %4 = arith.cmpf ole, %2, %3 : vector<1x8x128xf32>
    %cst_2 = arith.constant 9.99999974E-6 : f32
    %5 = vector.broadcast %cst_2 : f32 to vector<1x8x128xf32>
    %6 = arith.select %4, %5, %2 : vector<1x8x128xi1>, vector<1x8x128xf32>
    %7 = math.log %6 : vector<1x8x128xf32>
    %8 = vector.broadcast %1 : f32 to vector<1x8x128xf32>
    %9 = arith.mulf %8, %7 : vector<1x8x128xf32>
    %10 = math.exp %9 : vector<1x8x128xf32>
    %c0_3 = arith.constant 0 : index
    %c0_4 = arith.constant 0 : index
    %c0_5 = arith.constant 0 : index
    %11 = vector.load %arg4[%c0_3, %c0_4, %c0_5] : memref<1x8x128xf32, #tpu.memory_space<vmem>>, vector<1x8x128xf32>
    tpu.vector_store %arg4[%c0_3, %c0_4, %c0_5], %10 {strides = array<i32>} : memref<1x8x128xf32, #tpu.memory_space<vmem>>, vector<1x8x128xf32>,
    return
  }
  func.func @transform_0(%arg0: i32, %arg1: i32, %arg2: memref<2xf32, #tpu.memory_space<smem>>) -> (i32, i32, i32) {
    %c0_i32 = arith.constant 0 : i32
    %c0_i32_0 = arith.constant 0 : i32
    return %arg0, %arg1, %c0_i32 : i32, i32, i32
  }
  func.func @transform_1(%arg0: i32, %arg1: i32, %arg2: memref<2xf32, #tpu.memory_space<smem>>) -> (i32, i32, i32) {
    %c0_i32 = arith.constant 0 : i32
    %c0_i32_0 = arith.constant 0 : i32
    return %arg0, %arg1, %c0_i32 : i32, i32, i32
  }
}

</mosaic_0001>

<bundles_post_ra>
// kernel: tpu_custom_call.1
= control target key start
LH: loop header
LB: loop body
LE: loop exit
PB: predicated region body
PF: predicated region fallthrough
CT: control target
= control target key end

     0   :  { %s460_s9 = smov [#allocation3]   ;;  %s622_s0 = inlined_call_operand.hbm [shape: f32[2], index: 0, kind: input, shape index: {}]   ;;  %s623_s1 = inlined_call_operand.hbm [shape: f32[2,8,128], index: 1, kind: input, shape index: {}]   ;;  %s624_s2 = inlined_call_operand.hbm [shape: f32[2,8,128], index: 2, kind: output, shape index: {}]  }
   0x1   :  { %8 = dma.hbm_to_smem %s622_s0, 16, %s460_s9, [#allocation2] }
   0x2   :  { %426 = dma.done.wait [#allocation2], 16 }
   0x3   :  { %427 = vsyncadd [#allocation2], 4294967280 }
   0x4   :  { %10 = sfence }
   0x5   :  { %11 = vsyncpa [#allocation5], 0 }
   0x6   :  { %13 = vsyncpa [#allocation5 + $0x1], 0 }
   0x7   :  { %14 = vsyncpa [#allocation6], 0 }
   0x8   :  { %16 = vsyncpa [#allocation6 + $0x1], 0  ;;  %s481_s12 = smov 0   ;;  %s483_s13 = smov 0  }
   0x9   :  { %s485_s14 = smov 0   ;;  %s487_s15 = smov 0  }
   0xa   :  { %s489_s16 = smov 0   ;;  %s491_s17 = smov 0  }
   0xb LB: > { %s260_s0 = sadd.s32 4294967295, %s458_s17   ;;  %s261_s18 = sadd.s32 4294967294, %s458_s17   ;;  %s458_s17 = sphi %s491_s17, %s22_s17   ;;  %s454_s16 = sphi %s489_s16, %s636_s16   ;;  %s450_s15 = sphi %s487_s15, %s635_s15   ;;  %s446_s14 = sphi %s485_s14, %s634_s14   ;;  %s442_s13 = sphi %s483_s13, %s633_s13   ;;  %s438_s12 = sphi %s481_s12, %s632_s12  }
   0xc   : > { %s34_s19 = sadd.s32 1, %s454_s16  ;;  %s43_s20 = sadd.s32 1, %s446_s14 }
   0xd   : > { %p36_p0 = scmp.ge.s32.totalorder %s34_s19, 2  ;;  %p50_p1 = scmp.ne.s32.totalorder %s446_s14, %s442_s13 }
   0xe   : > { %p51_p2 = scmp.eq.s32.totalorder %s458_s17, 0  ;;  %p56_p3 = scmp.ne.s32.totalorder %s442_s13, %s438_s12 }
   0xf   : > { %s638_s19 = smov (%p36_p0, %s34_s19), 0  ;;  %p57_p5 = scmp.eq.s32.totalorder %s260_s0, 0 }
  0x10   : > { %p522_p4 = por %p51_p2, %p50_p1  ;;  %s38_s22 = ssub.s32 %s454_s16, %s638_s19 }
  0x11   : > { %p82_p6 = scmp.eq.s32.totalorder %s260_s0, 1  ;;  %p41_p7 = scmp.eq.s32.totalorder %s38_s22, 0 }
  0x12   : > { %p528_p8 = por %p57_p5, %p56_p3  ;;  %p88_p10 = scmp.eq.s32.totalorder %s261_s18, 1 }
  0x13   : > { %p532_p9 = por %p82_p6, %p50_p1  ;;  %p285_p13 = scmp.lt.s32.totalorder %s458_s17, 2 }
  0x14   : > { %s537_s25 = scalar_select %p41_p7, %s446_s14, %s43_s20  }
  0x15   : > { %p539_p11 = por %p88_p10, %p56_p3  ;;  %s108_s27 = sand.u32 1, %s446_s14  }
  0x16   : > { %s264_s28 = sshll.u32 %s108_s27, 3  ;;  %s265_s29 = sshll.u32 %s454_s16, 7 }
  0x17   : > { %s628_s26 = scalar_select %p539_p11, 1, 0 }
  0x18   : > { %s118_s4 = scalar_lea.hbm %s623_s1, %s265_s29  ;;  %s112_s5 = scalar_lea.vmem [#allocation4], %s264_s28 }
  0x19   : > { %s120_s6 = sshll.u32 %s112_s5, 4  ;;  %p552_p0 = pnand %p285_p13, %p522_p4  ;;  %s121_s6 = int_to_ptr.vmem [resolvable:$true] %s120_s6 }
  0x1a   : > { %p266_p1 = scmp.ge.s32.totalorder %s458_s17, 1  ;;  %p125_p2 = scmp.lt.s32.totalorder %s458_s17, 3 }
  0x1b   : > { %s109_s8 = scalar_lea.sflag [#allocation5], %s108_s27  ;;  %p350_p3 = pneg %p552_p0 }
  0x1c   : > { %s361_s9 = scalar_lea.vmem %s121_s6, 128  ;;  %s461_s10 = smov [#allocation4]  }
  0x1d   : > { %p362_p5 = scmp.ne.s32.totalorder %s121_s6, %s361_s9  ;;  %s366_s11 = sshll.u32 %s461_s10, 4  ;;  %s367_s11 = int_to_ptr.vmem [resolvable:$false] %s366_s11 }
  0x1e   : > { %s368_s0 = scalar_lea.vmem %s367_s11, 256  ;;  %p369_p10 = scmp.lt.s32.totalorder %s121_s6, %s367_s11 }
  0x1f   : > { %p364_p6 = pnand %p362_p5, %p350_p3  ;;  %p370_p12 = scmp.lt.s32.totalorder %s368_s0, %s361_s9 }
  0x21   : > { %p365_p7 = pneg %p364_p6  ;;  %p371_p4 = por %p370_p12, %p369_p10 }
  0x23   : > { %p372_p13 = pnand %p371_p4, %p365_p7 }
  0x25   : > { %375 = shalt.err (!%p372_p13)
}
  0x26   : > { %280 = dma.hbm_to_vmem [thread:$0]  (!%p552_p0), %s118_s4, 128, %s121_s6, %s109_s8  }
  0x27   : > { %p126_p11 = pnand %p266_p1, %p125_p2 }
  0x28   : > { %s567_s18 = sand.u32 (!%p126_p11), 1, %s442_s13  }
  0x29   : > { %129 = sbr.rel (%p126_p11) target bundleno = 97 (0x61), region = 24  ;;  %s267_s20 = sshll.u32 (!%p126_p11), %s567_s18, 3 }
  0x2a   : > { %s132_s21 = scalar_lea.sflag (!%p126_p11), [#allocation5], %s567_s18  ;;  %s135_s22 = scalar_lea.vmem (!%p126_p11), [#allocation4], %s267_s20 }
  0x2e   : > { %429 = dma.done.wait (%p528_p8), %s132_s21, 128  }
  0x2f   : > { %431 = vsyncadd (%p528_p8), %s132_s21, 4294967168  ;;  %v155_v0 = vld [vmem:[%s135_s22] sm:$0xff]  ;;  %s154_s27 = sld [smem:[#allocation3 + %s450_s15]]  ;;  %s153_s28 = scalar_lea.vmem [#allocation7], %s267_s20 }
  0x30   : > { %vm156_vm0 = vcmp.le.f32.partialorder %v155_v0, 0.0  ;;  %s180_s29 = sshll.u32 %s153_s28, 4  ;;  %s270_s30 = sshll.u32 %s450_s15, 7  ;;  %s577_s29 = int_to_ptr.vmem [resolvable:$true] %s180_s29 }
  0x31   : > { %v157_v1 = vsel %vm156_vm0, 1e-05, %v155_v0  ;;  %s178_s4 = scalar_lea.hbm %s624_s2, %s270_s30  ;;  %s166_s5 = scalar_lea.sflag [#allocation6], %s567_s18 }
  0x32   : > { %336 = vlog2.f32 %v157_v1  ;;  %s376_s6 = scalar_lea.vmem %s577_s29, 128  ;;  %s462_s7 = smov [#allocation7]  }
  0x33   : > { %p377_p8 = scmp.ne.s32.totalorder %s577_s29, %s376_s6  ;;  %s380_s8 = sshll.u32 %s462_s7, 4  ;;  %s381_s8 = int_to_ptr.vmem [resolvable:$false] %s380_s8 }
  0x34   : > { %s382_s15 = scalar_lea.vmem %s381_s8, 256  ;;  %p383_p0 = scmp.lt.s32.totalorder %s577_s29, %s381_s8 }
  0x35   : > { %v160_v3 = vstv %s154_s27  ;;  %p378_p11 = pnand %p377_p8, %p532_p9  ;;  %p384_p1 = scmp.lt.s32.totalorder %s382_s15, %s376_s6 }
  0x37   : > { %p379_p12 = pneg %p378_p11  ;;  %p385_p2 = por %p384_p1, %p383_p0 }
  0x39   : > { %p386_p3 = pnand %p385_p2, %p379_p12 }
  0x3f   : > { %v337_v2 = vpop.eup %336 }
  0x40   : > { %v159_v4 = vmul.f32 0.6931472, %v337_v2 }
  0x42   : > { %v161_v5 = vmul.f32 %v160_v3, %v159_v4 }
  0x44   : > { %v162_v6 = vmul.f32 1.442695, %v161_v5 }
  0x46   : > { %338 = vpow2.f32 %v162_v6 }
  0x53   : > { %v339_v7 = vpop.eup %338 }
  0x54   : > { %164 = vst [vmem:[%s153_s28] sm:$0xff] %v339_v7 }
  0x55   : > { %389 = shalt.err (!%p386_p3)
}
  0x56   : > { %s390_s9 = scalar_lea.hbm %s178_s4, 128  ;;  %s394_s0 = scalar_lea.hbm %s624_s2, 256 }
  0x57   : > { %p391_p5 = scmp.ne.s32.totalorder %s178_s4, %s390_s9  ;;  %p395_p10 = scmp.lt.s32.totalorder %s178_s4, %s624_s2 }
  0x58   : > { %p396_p4 = scmp.lt.s32.totalorder %s394_s0, %s390_s9 }
  0x59   : > { %p392_p6 = pnand %p391_p5, %p532_p9 }
  0x5a   : > { %p397_p13 = por %p396_p4, %p395_p10 }
  0x5b   : > { %p393_p7 = pneg %p392_p6 }
  0x5d   : > { %p398_p8 = pnand %p397_p13, %p393_p7 }
  0x5f   : > { %401 = shalt.err (!%p398_p8)
}
  0x60   : > { %275 = dma.vmem_to_hbm [thread:$0]  (%p532_p9), %s577_s29, 128, %s178_s4, %s166_s5  }
  0x61 PF: > { %s192_s21 = sand.u32 1, %s438_s12   ;;  %p630_p11 = scmp.ne.s32.totalorder %s628_s26, 0 }
  0x62   : > { %p631_p12 = scmp.ge.s32.totalorder %s458_s17, 2  ;;  %s193_s22 = scalar_lea.sflag [#allocation6], %s192_s21 }
  0x64   : > { %p282_p0 = pnand %p631_p12, %p630_p11 }
  0x66   : > { %p283_p1 = pneg %p282_p0 }
  0x68   : > { %433 = dma.done.wait (%p283_p1), %s193_s22, 128  }
  0x69   : > { %435 = vsyncadd (%p283_p1), %s193_s22, 4294967168  ;;  %s22_s17 = sadd.s32 1, %s458_s17   ;;  %s632_s12 = smov %s442_s13 }
  0x6a   : > { %p19_p2 = scmp.ge.s32.totalorder %s22_s17, 4   ;;  %s633_s13 = smov %s446_s14 }
  0x6b   : > { %s634_s14 = smov %s537_s25  ;;  %s635_s15 = smov %s454_s16 }
  0x6c   : > { %s636_s16 = smov %s638_s19  ;;  %21 = sbr.rel (!%p19_p2) target bundleno = 11 (0xb), region = 69 }
  0x71   :  { %198 = vsyncpa [#allocation5], 1 }
  0x72   :  { %200 = vsyncpa [#allocation5 + $0x1], 1 }
  0x73   :  { %201 = vsyncpa [#allocation6], 1 }
  0x74   :  { %203 = vsyncpa [#allocation6 + $0x1], 1 }

</bundles_post_ra>
